<compile_context>
chip_gen: v7x
topology: tpu7x:2x2x1
jax: 0.10.0
libtpu: 0.0.40
codegen_flags: <defaults>
</compile_context>

<pallas_src>
import math
from functools import partial

import jax
import jax.numpy as jnp
from jax.experimental import pallas as pl
from jax.experimental.pallas import tpu as pltpu

F32 = jnp.float32
BF16 = jnp.bfloat16

# -------------------------------------------------------------------------
# helpers
# -------------------------------------------------------------------------

def _round_up(x, m):
    return ((x + m - 1) // m) * m


def _pad_rows(x, rows_to):
    rows = x.shape[0]
    rp = _round_up(rows, rows_to)
    if rp == rows:
        return x
    pad = jnp.zeros((rp - rows,) + x.shape[1:], x.dtype)
    return jnp.concatenate([x, pad], axis=0)


def _softplus(x):
    # matches torch.nn.Softplus(beta=1, threshold=20)
    return jnp.where(x > 20.0, x, jnp.log(1.0 + jnp.exp(jnp.minimum(x, 20.0))))


def _sigmoid(x):
    # numerically stable logistic; reciprocal goes to the EUP (approx) slot
    z = jnp.exp(-jnp.abs(x))
    r = pl.reciprocal(1.0 + z, approx=True)
    return jnp.where(x >= 0.0, r, z * r)


def _msg_cfg():
    """Per-generation (edge-tile, vmem_limit) for the fused message/scatter kernel."""
    try:
        cap = pltpu.get_tpu_info().vmem_capacity_bytes
    except Exception:
        cap = 128 * 1024 * 1024
    if cap <= 64 * 1024 * 1024:            # v7x: 64 MiB VMEM per TensorCore
        return 512, 44 * 1024 * 1024       # bf16 streams keep tile=512 in budget
    return 512, 64 * 1024 * 1024           # v5e / v6e: 128 MiB physical


def _const_spec(shape, grid_dims=1):
    """Constant-index BlockSpec (weights/biases stay VMEM resident)."""
    if grid_dims == 1:
        return pl.BlockSpec(shape, lambda i: (0, 0))
    return pl.BlockSpec(shape, lambda p, i: (0, 0))


# -------------------------------------------------------------------------
# tiled linear:  y = x @ W + b   (bf16 MXU operands, f32 accumulation)
# -------------------------------------------------------------------------

def _linear_kernel(x_ref, w_ref, b_ref, o_ref):
    x = x_ref[...].astype(BF16)
    y = jnp.dot(x, w_ref[...], preferred_element_type=jnp.float32) + b_ref[...]
    o_ref[...] = y.astype(o_ref.dtype)


def pallas_linear(x, w_bf16, b, *, out_dtype=F32, max_tile=512):
    rows, K = x.shape
    Fo = w_bf16.shape[1]
    tile = min(_round_up(rows, 8), max_tile)
    xp = _pad_rows(x, tile)
    RP = xp.shape[0]
    out = pl.pallas_call(
        _linear_kernel,
        out_shape=jax.ShapeDtypeStruct((RP, Fo), out_dtype),
        grid_spec=pltpu.PrefetchScalarGridSpec(
            num_scalar_prefetch=0, grid=(RP // tile,),
            in_specs=[pl.BlockSpec((tile, K), lambda i: (i, 0)),
                      _const_spec((K, Fo)),
                      _const_spec((1, Fo))],
            out_specs=pl.BlockSpec((tile, Fo), lambda i: (i, 0))),
        compiler_params=pltpu.CompilerParams(
            dimension_semantics=("parallel",)),
    )(xp, w_bf16, b)
    return out[:rows]


# -------------------------------------------------------------------------
# RBF expansion + 2-layer MLP (edge distance d computed in glue: lane-sparse)
# emits bf16: edge_features only feed MXU matmuls downstream
# -------------------------------------------------------------------------

def _rbf_kernel(d_ref, centers_ref, w1_ref, b1_ref, w2_ref, b2_ref, o_ref, *, gamma):
    d = d_ref[...]                                               # (T, 1)
    rbf = jnp.exp(-gamma * (d - centers_ref[...]) ** 2)          # (T, bins)
    h = _softplus(jnp.dot(rbf.astype(BF16), w1_ref[...],
                          preferred_element_type=jnp.float32) + b1_ref[...])
    y = (jnp.dot(h.astype(BF16), w2_ref[...],
                 preferred_element_type=jnp.float32) + b2_ref[...])
    o_ref[...] = y.astype(o_ref.dtype)


def pallas_rbf(d, rp, *, max_tile=512):
    E = d.shape[0]
    bins = rp["centers"].shape[1]
    w1, b1 = rp["lin1"]
    w2, b2 = rp["lin2"]
    Co = w2.shape[1]
    tile = min(_round_up(E, 8), max_tile)
    dp = _pad_rows(d, tile)
    EP = dp.shape[0]
    out = pl.pallas_call(
        partial(_rbf_kernel, gamma=rp["gamma"]),
        out_shape=jax.ShapeDtypeStruct((EP, Co), BF16),
        grid_spec=pltpu.PrefetchScalarGridSpec(
            num_scalar_prefetch=0, grid=(EP // tile,),
            in_specs=[pl.BlockSpec((tile, 1), lambda i: (i, 0)),
                      _const_spec((1, bins)),
                      _const_spec(w1.shape), _const_spec((1, w1.shape[1])),
                      _const_spec(w2.shape), _const_spec((1, Co))],
            out_specs=pl.BlockSpec((tile, Co), lambda i: (i, 0))),
        compiler_params=pltpu.CompilerParams(
            dimension_semantics=("parallel",)),
    )(dp, rp["centers"], w1, b1, w2, b2)
    return out[:E]


# -------------------------------------------------------------------------
# fused per-edge attention message + edge projection + scatter-add over dst
#   grid = (slabs, edge_tiles_per_slab)
#   slab axis is "parallel" (v7x megacore), tile axis "arbitrary" (accumulator)
# -------------------------------------------------------------------------

def _msg_scatter_kernel(dst_ref, xi_ref, xj_ref, ef_ref,
                        we_ref, be_ref,
                        ln_a_w_ref, ln_a_b_ref, w_upd_ref, b_upd_ref,
                        w_msg_ref, b_msg_ref, ln_m_w_ref, ln_m_b_ref,
                        agg_ref, *, heads, channels):
    C = channels
    HC = heads * C
    inv_sqrt_3c = 1.0 / math.sqrt(3.0 * C)

    @pl.when(pl.program_id(1) == 0)
    def _init():
        agg_ref[...] = jnp.zeros_like(agg_ref)

    xi = xi_ref[...]          # (TE, 3*H*C) bf16 = [q | k | v] gathered at dst (node i)
    xj = xj_ref[...]          # (TE, 3*H*C) bf16 gathered at src (node j)

    # fused per-layer edge projection: ee = edge_features @ we + be   (TE, H*C)
    ee = (jnp.dot(ef_ref[...], we_ref[...], preferred_element_type=jnp.float32)
          + be_ref[...])
    ee_bf = ee.astype(BF16)

    ln_a_w = ln_a_w_ref[...]
    ln_a_b = ln_a_b_ref[...]
    w_upd = w_upd_ref[...]
    b_upd = b_upd_ref[...]
    w_msg = w_msg_ref[...]
    b_msg = b_msg_ref[...]
    ln_m_w = ln_m_w_ref[...]
    ln_m_b = ln_m_b_ref[...]

    msg_heads = []
    for h in range(heads):                         # static unroll, lane-aligned slices
        lo, hi = h * C, (h + 1) * C
        q = xi[:, lo:hi].astype(F32)               # elementwise math in f32
        k_i = xi[:, HC + lo:HC + hi].astype(F32)
        k_j = xj[:, HC + lo:HC + hi].astype(F32)
        v_i = xi[:, 2 * HC + lo:2 * HC + hi]       # bf16, MXU operands
        v_j = xj[:, 2 * HC + lo:2 * HC + hi]
        e_f = ee[:, lo:hi]                         # f32 for alpha
        e_b = ee_bf[:, lo:hi]                      # bf16 for matmul

        # alpha = cat(q_i,q_i,q_i) * cat(k_i,k_j,e) / sqrt(3C); LN; sigmoid gate
        alpha = jnp.concatenate([q * k_i, q * k_j, q * e_f], axis=-1) * inv_sqrt_3c
        mu = jnp.mean(alpha, axis=-1, keepdims=True)
        var = jnp.mean((alpha - mu) ** 2, axis=-1, keepdims=True)
        a_n = (alpha - mu) * jax.lax.rsqrt(var + 1e-5) * ln_a_w + ln_a_b
        gate = _sigmoid(a_n)

        # msg_update(cat(v_i, v_j, e)): single K=3C matmul feeds the 256-deep MXU
        vcat = jnp.concatenate([v_i, v_j, e_b], axis=-1)          # (TE, 3C) bf16
        upd = (jnp.dot(vcat, w_upd, preferred_element_type=jnp.float32) + b_upd)
        m = upd * gate
        m = (jnp.dot(m.astype(BF16), w_msg, preferred_element_type=jnp.float32)
             + b_msg)
        mu2 = jnp.mean(m, axis=-1, keepdims=True)
        var2 = jnp.mean((m - mu2) ** 2, axis=-1, keepdims=True)
        msg_heads.append((m - mu2) * jax.lax.rsqrt(var2 + 1e-5) * ln_m_w + ln_m_b)

    msg = jnp.concatenate(msg_heads, axis=-1).astype(BF16)        # (TE, H*C)

    # scatter-add over destination nodes: in-VMEM one-hot @ message (MXU)
    # padded edges carry dst == n_nodes and never match the iota -> discarded
    n_nodes = agg_ref.shape[1]
    te = msg.shape[0]
    node_iota = jax.lax.broadcasted_iota(jnp.int32, (n_nodes, te), 0)
    onehot = jnp.where(node_iota == dst_ref[...], 1.0, 0.0).astype(BF16)
    agg_ref[...] += jnp.dot(onehot, msg, preferred_element_type=jnp.float32)[None]


def pallas_msg_scatter(dst_scatter, xi, xj, ef, lp, *, n_nodes, tile, slabs,
                       vmem_limit, heads, channels):
    EP = xi.shape[0]
    HC = heads * channels
    C = channels
    C3 = 3 * channels
    T = EP // (slabs * tile)                       # edge tiles per slab

    row3 = pl.BlockSpec((tile, 3 * HC), lambda p, i: (p * T + i, 0))
    return pl.pallas_call(
        partial(_msg_scatter_kernel, heads=heads, channels=channels),
        out_shape=jax.ShapeDtypeStruct((slabs, n_nodes, HC), F32),
        grid_spec=pltpu.PrefetchScalarGridSpec(
            num_scalar_prefetch=0, grid=(slabs, T),
            in_specs=[pl.BlockSpec((1, tile), lambda p, i: (0, p * T + i)),  # dst ids
                      row3, row3,
                      pl.BlockSpec((tile, C), lambda p, i: (p * T + i, 0)),  # edge feats
                      _const_spec((C, HC), 2), _const_spec((1, HC), 2),
                      _const_spec((1, C3), 2), _const_spec((1, C3), 2),
                      _const_spec((C3, C3), 2), _const_spec((1, C3), 2),
                      _const_spec((C3, C), 2), _const_spec((1, C), 2),
                      _const_spec((1, C), 2), _const_spec((1, C), 2)],
            out_specs=pl.BlockSpec((1, n_nodes, HC), lambda p, i: (p, 0, 0))),
        compiler_params=pltpu.CompilerParams(
            dimension_semantics=("parallel", "arbitrary"),
            vmem_limit_bytes=vmem_limit),
    )(dst_scatter, xi, xj, ef,
      lp["we"], lp["be"],
      lp["ln_a_w"], lp["ln_a_b"], lp["w_upd"], lp["b_upd"],
      lp["w_msg"], lp["b_msg"], lp["ln_m_w"], lp["ln_m_b"])


# -------------------------------------------------------------------------
# node update: lin_concate -> BatchNorm1d (eval, explicit stats) -> res -> softplus
# -------------------------------------------------------------------------

def _node_update_kernel(x_ref, agg_ref, wcat_ref, bcat_ref,
                        bn_w_ref, bn_b_ref, bn_mu_ref, bn_var_ref, o_ref):
    y = (jnp.dot(agg_ref[...].astype(BF16), wcat_ref[...],
                 preferred_element_type=jnp.float32) + bcat_ref[...])
    bn = ((y - bn_mu_ref[...]) * jax.lax.rsqrt(bn_var_ref[...] + 1e-5)
          * bn_w_ref[...] + bn_b_ref[...])
    o_ref[...] = _softplus(x_ref[...] + bn)


def pallas_node_update(x, agg, lp, *, max_tile=512):
    N, C = x.shape
    HC = agg.shape[1]
    tile = min(_round_up(N, 8), max_tile)
    xp = _pad_rows(x, tile)
    ap = _pad_rows(agg, tile)
    NP = xp.shape[0]
    out = pl.pallas_call(
        _node_update_kernel,
        out_shape=jax.ShapeDtypeStruct((NP, C), F32),
        grid_spec=pltpu.PrefetchScalarGridSpec(
            num_scalar_prefetch=0, grid=(NP // tile,),
            in_specs=[pl.BlockSpec((tile, C), lambda i: (i, 0)),
                      pl.BlockSpec((tile, HC), lambda i: (i, 0)),
                      _const_spec((HC, C)), _const_spec((1, C)),
                      _const_spec((1, C)), _const_spec((1, C)),
                      _const_spec((1, C)), _const_spec((1, C))],
            out_specs=pl.BlockSpec((tile, C), lambda i: (i, 0))),
        compiler_params=pltpu.CompilerParams(
            dimension_semantics=("parallel",)),
    )(xp, ap, lp["wcat"], lp["bcat"],
      lp["bn_w"], lp["bn_b"], lp["bn_mean"], lp["bn_var"])
    return out[:N]


# -------------------------------------------------------------------------
# readout: scatter-mean pooling + fc + SiLU   (fc_out 128->1 stays in XLA)
# -------------------------------------------------------------------------

def _readout_kernel(pool_ref, x_ref, wfc_ref, bfc_ref, o_ref):
    pooled = jnp.dot(pool_ref[...].astype(BF16), x_ref[...].astype(BF16),
                     preferred_element_type=jnp.float32)
    h = (jnp.dot(pooled.astype(BF16), wfc_ref[...],
                 preferred_element_type=jnp.float32) + bfc_ref[...])
    o_ref[...] = h * _sigmoid(h)                 # SiLU


def pallas_readout(pool, x, wfc, bfc):
    B = pool.shape[0]
    Fc = wfc.shape[1]
    vmem = pl.BlockSpec(memory_space=pltpu.MemorySpace.VMEM)
    return pl.pallas_call(
        _readout_kernel,
        out_shape=jax.ShapeDtypeStruct((B, Fc), F32),
        in_specs=[vmem, vmem, vmem, vmem],
        out_specs=vmem,
    )(pool, x, wfc, bfc)


# -------------------------------------------------------------------------
# parameter construction (deterministic, PyTorch-Linear-style init)
# -------------------------------------------------------------------------

def init_linear(key, fan_in, fan_out):
    k1, k2 = jax.random.split(key)
    bound = 1.0 / math.sqrt(fan_in)
    w = jax.random.uniform(k1, (fan_in, fan_out), F32, -bound, bound)  # [in, out]
    b = jax.random.uniform(k2, (fan_out,), F32, -bound, bound)
    return w, b


def _pack(w, b):
    return w.astype(BF16), b.reshape(1, -1).astype(F32)


def make_params(key, *, atom_in=92, node_feat=128, edge_feat=128, heads=4,
                conv_layers=5, fc_feat=128, out_feat=1):
    keys = iter(jax.random.split(key, 64))
    C, H = node_feat, heads
    HC, C3 = H * C, 3 * C
    p = {}
    p["atom_embedding"] = _pack(*init_linear(next(keys), atom_in, C))

    # rbf: RBFExpansion(0, 8, bins=edge_feat) -> Linear -> Softplus -> Linear
    centers = jnp.linspace(0.0, 8.0, edge_feat).astype(F32).reshape(1, -1)
    gamma = 1.0 / (8.0 / (edge_feat - 1))       # lengthscale = mean(diff(centers))
    p["rbf"] = {
        "centers": centers, "gamma": float(gamma),
        "lin1": _pack(*init_linear(next(keys), edge_feat, C)),
        "lin2": _pack(*init_linear(next(keys), C, C)),
    }

    layers = []
    for _ in range(conv_layers):
        wq, bq = init_linear(next(keys), C, HC)
        wk, bk = init_linear(next(keys), C, HC)
        wv, bv = init_linear(next(keys), C, HC)
        wqkv = jnp.concatenate([wq, wk, wv], axis=1)       # fused q|k|v projection
        bqkv = jnp.concatenate([bq, bk, bv])
        we, be = init_linear(next(keys), C, HC)
        w_upd, b_upd = init_linear(next(keys), C3, C3)
        w_msg, b_msg = init_linear(next(keys), C3, C)
        wcat, bcat = init_linear(next(keys), HC, C)
        layers.append(dict(
            wqkv=wqkv.astype(BF16), bqkv=bqkv.reshape(1, -1),
            we=we.astype(BF16), be=be.reshape(1, -1),
            w_upd=w_upd.astype(BF16), b_upd=b_upd.reshape(1, -1),
            w_msg=w_msg.astype(BF16), b_msg=b_msg.reshape(1, -1),
            ln_a_w=jnp.ones((1, C3), F32), ln_a_b=jnp.zeros((1, C3), F32),
            ln_m_w=jnp.ones((1, C), F32), ln_m_b=jnp.zeros((1, C), F32),
            wcat=wcat.astype(BF16), bcat=bcat.reshape(1, -1),
            # explicit BatchNorm1d eval-mode stats / affine (defaults)
            bn_w=jnp.ones((1, C), F32), bn_b=jnp.zeros((1, C), F32),
            bn_mean=jnp.zeros((1, C), F32), bn_var=jnp.ones((1, C), F32),
        ))
    p["att_layers"] = layers

    p["fc"] = _pack(*init_linear(next(keys), C, fc_feat))
    w_out, _ = init_linear(next(keys), fc_feat, out_feat)
    b_out = jnp.full((out_feat,), math.log(0.7), F32)   # avg_gap bias init
    p["fc_out"] = (w_out, b_out)                        # applied in XLA glue
    return p


# -------------------------------------------------------------------------
# full forward pass
# -------------------------------------------------------------------------

def matformer_forward(params, x_atoms, edge_index, edge_attr, batch, num_graphs,
                      heads=4, node_feat=128):
    N = x_atoms.shape[0]
    E = edge_index.shape[1]
    H, C = heads, node_feat
    HC = H * C

    # atom embedding
    node = pallas_linear(x_atoms, *params["atom_embedding"])            # [N, C] f32

    # edge length in glue (edge_attr last dim = 3 is lane-sparse); RBF MLP in Pallas
    d = jnp.sqrt(jnp.sum(edge_attr * edge_attr, axis=1, keepdims=True))  # [E, 1]
    edge_features = pallas_rbf(d, params["rbf"])                         # [E, C] bf16

    src = edge_index[0].astype(jnp.int32)   # j (source)
    dst = edge_index[1].astype(jnp.int32)   # i (target / aggregation index)

    # edge tiling; slabs split the edge axis for the "parallel" megacore axis.
    # slabs == 2 only when E > tile, i.e. tile == max_tile (multiple of 128).
    max_tile, msg_vmem = _msg_cfg()
    tile = min(_round_up(E, 8), max_tile)
    slabs = 2 if E > max_tile else 1
    E_pad = _round_up(E, slabs * tile)
    pad_e = E_pad - E
    if pad_e:
        dst_g = jnp.concatenate([dst, jnp.zeros((pad_e,), jnp.int32)])
        src_g = jnp.concatenate([src, jnp.zeros((pad_e,), jnp.int32)])
        # padded edges scatter to node N (out of range) -> discarded by one-hot
        dst_scatter = jnp.concatenate([dst, jnp.full((pad_e,), N, jnp.int32)])
    else:
        dst_g, src_g, dst_scatter = dst, src, dst
    dst_scatter = dst_scatter.reshape(1, E_pad)
    ef_pad = _pad_rows(edge_features, E_pad)                             # [E_pad, C] bf16

    for lp in params["att_layers"]:
        # fused q|k|v projection (node read once), bf16 output -> bf16 gathers
        qkv = pallas_linear(node, lp["wqkv"], lp["bqkv"], out_dtype=BF16)  # [N, 3*HC]

        # sparse gathers stay in glue (data-dependent rows), now half the bytes
        xi = jnp.take(qkv, dst_g, axis=0)                                # [E_pad, 3*HC] bf16
        xj = jnp.take(qkv, src_g, axis=0)                                # [E_pad, 3*HC] bf16

        # fused edge projection + per-edge message + scatter-add into slab accumulators
        agg_slabs = pallas_msg_scatter(dst_scatter, xi, xj, ef_pad, lp,
                                       n_nodes=N, tile=tile, slabs=slabs,
                                       vmem_limit=msg_vmem,
                                       heads=H, channels=C)              # [slabs, N, HC]
        agg = jnp.sum(agg_slabs, axis=0)                                 # [N, HC] f32

        # lin_concate + BN(eval) + residual + softplus
        node = pallas_node_update(node, agg, lp)                         # [N, C]

    # scatter-mean pooling + fc(SiLU) in Pallas; fc_out (128->1) in XLA
    graph_ids = jnp.arange(num_graphs)
    mask = (batch[None, :] == graph_ids[:, None]).astype(F32)            # [B, N]
    counts = jnp.maximum(jnp.sum(mask, axis=1, keepdims=True), 1.0)
    pool = mask / counts

    wfc, bfc = params["fc"]
    feats = pallas_readout(pool, node, wfc, bfc)                         # [B, fc]
    wout, bout = params["fc_out"]
    out = feats @ wout + bout        # lane-sparse [B, 1] output kept in XLA
    return jnp.squeeze(out)                                              # [B]


# -------------------------------------------------------------------------
# main
# -------------------------------------------------------------------------

if __name__ == "__main__":
    key = jax.random.PRNGKey(0)
    k_par, k_x, k_ea = jax.random.split(key, 3)

    # small deterministic graph batch: 2 graphs x 4 nodes, 8 edges each
    N, B = 8, 2
    x_atoms = jax.random.normal(k_x, (N, 92), F32)

    src_list, dst_list = [], []
    for g in range(B):
        base = g * 4
        for i in range(4):
            for off in (1, 3):                # ring edges within the graph
                src_list.append(base + i)
                dst_list.append(base + (i + off) % 4)
    edge_index = jnp.array([src_list, dst_list], dtype=jnp.int32)      # [2, 16]
    E = edge_index.shape[1]

    edge_attr = jax.random.normal(k_ea, (E, 3), F32)                   # displacement vectors
    batch = jnp.array([0] * 4 + [1] * 4, dtype=jnp.int32)

    params = make_params(k_par)

    out = matformer_forward(params, x_atoms, edge_index, edge_attr, batch, B)
    out = jax.block_until_ready(out)

    assert out.shape == (B,), out.shape
    assert bool(jnp.all(jnp.isfinite(out)))
    print("KERNEL_OK")
</pallas_src>

<mosaic_0001>
module attributes {stable_mosaic.version = 11 : i64} {
  func.func @_linear_kernel(%arg0: i32, %arg1: memref<8x92xf32, #tpu.memory_space<vmem>>, %arg2: memref<92x128xbf16, #tpu.memory_space<vmem>>, %arg3: memref<1x128xf32, #tpu.memory_space<vmem>>, %arg4: memref<8x128xf32, #tpu.memory_space<vmem>>) attributes {dimension_semantics = [#tpu.dimension_semantics<parallel>], iteration_bounds = array<i64: 1>, scalar_prefetch = 0 : i64, scratch_operands = 0 : i64, tpu.core_type = #tpu.core_type<tc>, window_params = [{transform_indices = @transform_0, window_bounds = array<i64: 8, 92>}, {pipeline_mode = #tpu.pipeline_mode<synchronous>, transform_indices = @transform_1, window_bounds = array<i64: 92, 128>}, {pipeline_mode = #tpu.pipeline_mode<synchronous>, transform_indices = @transform_2, window_bounds = array<i64: 1, 128>}, {transform_indices = @transform_3, window_bounds = array<i64: 8, 128>}]} {
    %c0 = arith.constant 0 : index
    %c0_0 = arith.constant 0 : index
    %0 = vector.load %arg1[%c0, %c0_0] : memref<8x92xf32, #tpu.memory_space<vmem>>, vector<8x92xf32>
    %1 = arith.truncf %0 : vector<8x92xf32> to vector<8x92xbf16>
    %c0_1 = arith.constant 0 : index
    %c0_2 = arith.constant 0 : index
    %2 = vector.load %arg2[%c0_1, %c0_2] : memref<92x128xbf16, #tpu.memory_space<vmem>>, vector<92x128xbf16>
    %cst = arith.constant dense<0.000000e+00> : vector<8x128xf32>
    %3 = tpu.matmul %1, %2, %cst {dimension_numbers = #tpu.dot_dimension_numbers<[1], [0], [0], [1], [0, 0, 1, 1], [], []>} : vector<8x92xbf16>, vector<92x128xbf16>, vector<8x128xf32> -> vector<8x128xf32>
    %c0_3 = arith.constant 0 : index
    %c0_4 = arith.constant 0 : index
    %4 = vector.load %arg3[%c0_3, %c0_4] : memref<1x128xf32, #tpu.memory_space<vmem>>, vector<1x128xf32>
    %5 = vector.broadcast %4 : vector<1x128xf32> to vector<8x128xf32>
    %6 = arith.addf %3, %5 : vector<8x128xf32>
    %c0_5 = arith.constant 0 : index
    %c0_6 = arith.constant 0 : index
    %7 = vector.load %arg4[%c0_5, %c0_6] : memref<8x128xf32, #tpu.memory_space<vmem>>, vector<8x128xf32>
    tpu.vector_store %arg4[%c0_5, %c0_6], %6 {strides = array<i32>} : memref<8x128xf32, #tpu.memory_space<vmem>>, vector<8x128xf32>,
    return
  }
  func.func @transform_0(%arg0: i32) -> (i32, i32) {
    %c0_i32 = arith.constant 0 : i32
    %c0_i32_0 = arith.constant 0 : i32
    return %arg0, %c0_i32 : i32, i32
  }
  func.func @transform_1(%arg0: i32) -> (i32, i32) {
    %c0_i32 = arith.constant 0 : i32
    %c0_i32_0 = arith.constant 0 : i32
    %c0_i32_1 = arith.constant 0 : i32
    return %c0_i32, %c0_i32_0 : i32, i32
  }
  func.func @transform_2(%arg0: i32) -> (i32, i32) {
    %c0_i32 = arith.constant 0 : i32
    %c0_i32_0 = arith.constant 0 : i32
    %c0_i32_1 = arith.constant 0 : i32
    return %c0_i32, %c0_i32_0 : i32, i32
  }
  func.func @transform_3(%arg0: i32) -> (i32, i32) {
    %c0_i32 = arith.constant 0 : i32
    %c0_i32_0 = arith.constant 0 : i32
    return %arg0, %c0_i32 : i32, i32
  }
}

</mosaic_0001>

<bundles_post_ra>
// kernel: tpu_custom_call.1
= control target key start
LH: loop header
LB: loop body
LE: loop exit
PB: predicated region body
PF: predicated region fallthrough
CT: control target
= control target key end

     0   :  { %8 = vsyncpa [#allocation3], 0  ;;  %s352_s0 = inlined_call_operand.hbm [shape: f32[8,92], index: 0, kind: input, shape index: {}]   ;;  %s353_s1 = inlined_call_operand.hbm [shape: bf16[92,128], index: 1, kind: input, shape index: {}]   ;;  %s354_s2 = inlined_call_operand.vmem [shape: f32[1,128], index: 2, kind: input, shape index: {}]   ;;  %s355_s3 = inlined_call_operand.hbm [shape: f32[8,128], index: 3, kind: output, shape index: {}]  }
   0x1   :  { %9 = vsyncpa [#allocation6], 0 }
   0x2   :  { %10 = vsyncpa [#allocation4], 0  ;;  %s279_s12 = smov [#allocation2]   ;;  %s280_s14 = smov [#allocation5]  }
   0x3   :  { %s17_s13 = sshll.u32 %s279_s12, 4  ;;  %s26_s15 = sshll.u32 %s280_s14, 4  ;;  %s18_s13 = int_to_ptr.vmem [resolvable:$true] %s17_s13  ;;  %s306_s15 = int_to_ptr.vmem [resolvable:$true] %s26_s15 }
   0x4   :  { %s207_s18 = scalar_lea.hbm %s352_s0, 128 }
   0x5   :  { %p208_p0 = scmp.ne.s32.totalorder %s352_s0, %s207_s18  ;;  %p211_p1 = scmp.lt.u32.totalorder %s207_s18, %s352_s0 }
   0x7   :  { %p213_p2 = pnand %p211_p1, %p208_p0 }
   0x9   :  { %216 = shalt.err (!%p213_p2)
}
   0xa   :  { %s217_s23 = scalar_lea.vmem %s18_s13, 128  ;;  %p222_p4 = scmp.lt.s32.totalorder %s18_s13, %s18_s13 }
   0xb   :  { %p218_p3 = scmp.ne.s32.totalorder %s18_s13, %s217_s23  ;;  %p223_p5 = scmp.lt.s32.totalorder %s217_s23, %s217_s23 }
   0xd   :  { %p224_p6 = por %p223_p5, %p222_p4 }
   0xf   :  { %p225_p7 = pnand %p224_p6, %p218_p3 }
  0x11   :  { %228 = shalt.err (!%p225_p7)
}
  0x12   :  { %20 = dma.hbm_to_vmem [thread:$0]  %s352_s0, 128, %s18_s13, [#allocation3]  }
  0x13   :  { %s229_s28 = scalar_lea.hbm %s353_s1, 768 }
  0x14   :  { %p230_p8 = scmp.ne.s32.totalorder %s353_s1, %s229_s28  ;;  %p233_p9 = scmp.lt.u32.totalorder %s229_s28, %s353_s1 }
  0x16   :  { %p235_p10 = pnand %p233_p9, %p230_p8 }
  0x18   :  { %238 = shalt.err (!%p235_p10)
}
  0x19   :  { %s239_s6 = scalar_lea.vmem %s306_s15, 768  ;;  %p244_p12 = scmp.lt.s32.totalorder %s306_s15, %s306_s15 }
  0x1a   :  { %p240_p11 = scmp.ne.s32.totalorder %s306_s15, %s239_s6  ;;  %p245_p13 = scmp.lt.s32.totalorder %s239_s6, %s239_s6 }
  0x1c   :  { %p246_p0 = por %p245_p13, %p244_p12 }
  0x1e   :  { %p247_p1 = pnand %p246_p0, %p240_p11 }
  0x20   :  { %250 = shalt.err (!%p247_p1)
}
  0x21   :  { %s281_s0 = smov 64   ;;  %s282_s7 = smov 4  }
  0x22   :  { %32 = dma.hbm_to_vmem [thread:$0]  %s353_s1, 768, %s306_s15, [#allocation6], %s281_s0, %s281_s0, %s282_s7  }
  0x23   :  { %273 = dma.done.wait [#allocation3], 128  }
  0x24   :  { %274 = vsyncadd [#allocation3], 4294967168 }
  0x25   :  { %275 = dma.done.wait [#allocation6], 768  }
  0x26   :  { %276 = vsyncadd [#allocation6], 4294966528  ;;  %v283_v0 = vmov 0.0   ;;  %vm284_vm0 = vmmov 0   ;;  %v201_v1 = vld [vmem:[#allocation5] sm:$0xff]   ;;  %v202_v2 = vld [vmem:[#allocation5 + $0x8] sm:$0xff]  }
  0x27   :  { %178 = vmatprep.subr.bf16.mxu0 %v283_v0  ;;  %190 = vmatprep.mubr.msk.bf16.mxu0 %vm284_vm0, %v283_v0  ;;  %v203_v3 = vld [vmem:[#allocation5 + $0x10] sm:$0xff]   ;;  %v204_v4 = vld [vmem:[#allocation5 + $0x18] sm:$0xff]   ;;  %v205_v5 = vld [vmem:[#allocation5 + $0x20] sm:$0xff]   ;;  %vm102_vm1 = vcmask 1045504   ;;  %vm98_vm2 = vcmask 752640   ;;  %s285_s11 = smov [#allocation7]  }
  0x28   :  { %179 = vmatpush3.bf16.msra.mxu0 %v201_v1  ;;  %v206_v6 = vld [vmem:[#allocation5 + $0x28] sm:$0x3f]   ;;  %v42_v7 = vld [vmem:[#allocation2] sm:$0xff]  ;;  %s153_s12 = sshll.u32 %s285_s11, 4  ;;  %s154_s12 = int_to_ptr.vmem [resolvable:$true] %s153_s12 }
  0x29   :  { %180 = vmatprep.subr.bf16.mxu0 %v283_v0  ;;  %v104_v8 = vsel %vm102_vm1, %v206_v6, 0  ;;  %v43_v9 = vpack.c.bf16 %v42_v7, %v42_v7  ;;  %v163_v10 = vld [vmem:[%s354_s2] ss:$0 sm:$0xff]  ;;  %s251_s13 = scalar_lea.vmem %s154_s12, 128  ;;  %p256_p3 = scmp.lt.s32.totalorder %s154_s12, %s154_s12 }
  0x2a   :  { %p252_p2 = scmp.ne.s32.totalorder %s154_s12, %s251_s13  ;;  %p257_p4 = scmp.lt.s32.totalorder %s251_s13, %s251_s13 }
  0x2c   :  { %181 = vmatpush3.bf16.msra.mxu0 %v202_v2  ;;  %p258_p5 = por %p257_p4, %p256_p3 }
  0x2d   :  { %182 = vmatprep.subr.bf16.mxu0 %v283_v0 }
  0x2e   :  { %p259_p6 = pnand %p258_p5, %p252_p2 }
  0x30   :  { %183 = vmatpush3.bf16.msra.mxu0 %v203_v3 }
  0x31   :  { %184 = vmatprep.subr.bf16.mxu0 %v283_v0 }
  0x34   :  { %185 = vmatpush3.bf16.msra.mxu0 %v204_v4 }
  0x35   :  { %186 = vmatprep.subr.bf16.mxu0 %v283_v0 }
  0x38   :  { %187 = vmatpush3.bf16.msra.mxu0 %v205_v5 }
  0x39   :  { %188 = vmatprep.subr.bf16.mxu0 %v283_v0 }
  0x3c   :  { %189 = vmatpush3.bf16.msra.mxu0 %v104_v8 }
  0x3f   :  { %191 = vmatmul.mubr.msk.bf16.vlgmr.msra.gmra.mrb[0].mxu0 %vm98_vm2, %v43_v9 }
 0x112   :  { %v140_v11 = vpop.f32.mrb[0].mxu0 }
 0x113   :  { %v141_v12 = vadd.f32 %v163_v10, %v140_v11  ;;  %v192_v13 = vpop.f32.mrb[1].mxu0 }
 0x114   :  { %v143_v14 = vpop.f32.mrb[2].mxu0 }
 0x115   :  { %146 = vst [vmem:[#allocation7] sm:$0xff] %v141_v12  ;;  %v193_v15 = vpop.f32.mrb[3].mxu0 }
 0x116   :  { %262 = shalt.err (!%p259_p6)
}
 0x117   :  { %s263_s2 = scalar_lea.hbm %s355_s3, 128 }
 0x118   :  { %p264_p7 = scmp.ne.s32.totalorder %s355_s3, %s263_s2  ;;  %p267_p8 = scmp.lt.u32.totalorder %s263_s2, %s355_s3 }
 0x11a   :  { %p269_p9 = pnand %p267_p8, %p264_p7 }
 0x11c   :  { %272 = shalt.err (!%p269_p9)
}
 0x11d   :  { %156 = dma.vmem_to_hbm [thread:$0]  %s154_s12, 128, %s355_s3, [#allocation4]  }
 0x11e   :  { %277 = dma.done.wait [#allocation4], 128  }
 0x11f   :  { %278 = vsyncadd [#allocation4], 4294967168 }
 0x120   :  { %160 = vsyncpa [#allocation3], 1 }
 0x121   :  { %161 = vsyncpa [#allocation6], 1 }
 0x122   :  { %162 = vsyncpa [#allocation4], 1 }

</bundles_post_ra>
